<compile_context>
chip_gen: v7x
topology: tpu7x:2x2x1
jax: 0.10.0
libtpu: 0.0.40
codegen_flags: <defaults>
</compile_context>

<pallas_src>
import jax
import jax.numpy as jnp
from jax.experimental import pallas as pl
from jax.experimental.pallas import tpu as pltpu


def _make_mean_kernel(n, inv_n):
    """Returns a kernel over n input refs + 1 output ref (elementwise mean)."""

    def kernel(*refs):
        in_refs = refs[:n]
        o_ref = refs[n]
        # Unrolled per-lane VPU adds; accumulate in f32, scale by 1/N once.
        acc = in_refs[0][...].astype(jnp.float32)
        for r in in_refs[1:]:
            acc = acc + r[...].astype(jnp.float32)
        o_ref[...] = (acc * inv_n).astype(o_ref.dtype)

    return kernel


def mean_aggregator(x_list, *, max_lane_tile=1024, vmem_budget_bytes=None,
                    min_pallas_bytes=256 << 10):
    """x_list: list of (B, D) arrays (same shape/dtype). Returns (B, D) mean."""
    n = len(x_list)
    x0 = x_list[0]
    assert all(x.shape == x0.shape and x.dtype == x0.dtype for x in x_list)
    B, D = x0.shape
    dtype = x0.dtype
    itemsize = jnp.dtype(dtype).itemsize
    total = B * D
    inv_n = 1.0 / n

    # ---------------- Tiny-input fast path (module's real shapes). ----------------
    # pallas_call launch + DMA setup dominates below a few hundred KiB; a fused
    # XLA elementwise op is faster there.
    if (n + 1) * total * itemsize < min_pallas_bytes:
        acc = x_list[0].astype(jnp.float32)
        for x in x_list[1:]:
            acc = acc + x.astype(jnp.float32)
        return (acc * inv_n).astype(dtype)

    # ---------------- Generation-aware VMEM budget. ----------------
    try:
        vmem_cap = int(pltpu.get_tpu_info().vmem_capacity_bytes)
    except Exception:
        vmem_cap = 64 << 20  # conservative (v7x-safe) fallback
    is_small_vmem = vmem_cap <= (64 << 20)  # v7x-class: 2 TCs, 64 MiB / TC

    if vmem_budget_bytes is None:
        frac = 0.45
        # 128-MiB parts (v5e/v6e) with many inputs: keep per-input tiles large.
        if vmem_cap >= (96 << 20) and n >= 16:
            frac = 0.70
        vmem_budget_bytes = int(vmem_cap * frac)
        if is_small_vmem:
            # Never budget more than ~48 MiB of double-buffered footprint per TC.
            vmem_budget_bytes = min(vmem_budget_bytes, 48 << 20)

    # ---------------- Lane-dense 2D view (R, L) of each (B, D) input. ----------------
    L = None
    if total % 128 == 0:
        cand = min(max_lane_tile, total)
        cand -= cand % 128
        while cand >= 128:
            if total % cand == 0:
                L = cand
                break
            cand -= 128
    if L is not None:
        R = total // L
        xs = [x.reshape(R, L) for x in x_list]
    else:
        # No free lane-dense view: use (B, D) directly (full-extent lane dim,
        # masked tail stores are cheap under the HBM roofline; do NOT pad).
        R, L = B, D
        xs = list(x_list)

    # ---------------- Tile sizing from the VMEM budget. ----------------
    # Double-buffered (n inputs + 1 output) tiles of the *input* dtype; the f32
    # accumulator lives in vregs / compiler scratch, not in these DMA buffers.
    max_tile_elems = max(vmem_budget_bytes // (2 * (n + 1) * itemsize), 8 * 128)

    tl = L
    tb = min(max_tile_elems // max(L, 1), R)
    tb -= tb % 8
    if tb < 8:
        # Either R < 8 (full-extent rows are the only legal choice) or even an
        # 8-row, full-L tile exceeds the budget (huge L) -> tile lanes too.
        tb = 8 if R >= 8 else R
        per_row_elems = max(max_tile_elems // max(tb, 1), 128)
        if per_row_elems < L and L > 128:
            tl = max((per_row_elems // 128) * 128, 128)
        else:
            tl = L

    # v7x megacore: guarantee >=2 (ideally >=4) grid steps so both TCs get work.
    steps = pl.cdiv(R, tb) * pl.cdiv(L, tl)
    if is_small_vmem and R >= 16 and steps < 2:
        target = 4 if R >= 32 else 2
        new_tb = ((-(-R // target)) + 7) // 8 * 8
        if 8 <= new_tb < tb:
            tb = new_tb

    # vmem_limit derived from the actual pipelined footprint (+ headroom for
    # Mosaic internal scratch), clamped to physical capacity.
    footprint = 2 * (n + 1) * tb * tl * itemsize
    vmem_limit = int(min(max(footprint * 1.25 + (2 << 20), 16 << 20), vmem_cap))

    # ---------------- Grid / BlockSpecs. ----------------
    if tl == L:
        grid = (pl.cdiv(R, tb),)
        block = (tb, L)
        idx = lambda i: (i, 0)
        dims = ("parallel",)
    else:
        grid = (pl.cdiv(R, tb), pl.cdiv(L, tl))
        block = (tb, tl)
        idx = lambda i, j: (i, j)
        dims = ("parallel", "parallel")

    out_view = pl.pallas_call(
        _make_mean_kernel(n, inv_n),
        out_shape=jax.ShapeDtypeStruct((R, L), dtype),
        grid_spec=pl.GridSpec(
            grid=grid,
            in_specs=[pl.BlockSpec(block, idx) for _ in range(n)],
            out_specs=pl.BlockSpec(block, idx),
        ),
        compiler_params=pltpu.CompilerParams(
            dimension_semantics=dims,
            vmem_limit_bytes=vmem_limit,
        ),
    )(*xs)

    return out_view.reshape(B, D)


def _reference(x_list):
    return jnp.mean(jnp.stack(x_list, axis=1), axis=1)


if __name__ == "__main__":
    key = jax.random.PRNGKey(0)

    # 1) Module-consistent small shapes: 8 input feature streams of (B=2, D=32).
    #    Hits the tiny-input fast path (pallas_call overhead would dominate here).
    B, N, D = 2, 8, 32
    keys = jax.random.split(key, N)
    x_list = [jax.random.normal(k, (B, D), dtype=jnp.float32) for k in keys]
    out = jax.block_until_ready(mean_aggregator(x_list))
    ref = _reference(x_list)
    assert out.shape == (B, D)
    assert jnp.allclose(out, ref, atol=1e-6, rtol=1e-6)

    # 2) Force the Pallas kernel on the lane-dense (R, L) tiling path.
    B2, N2, D2 = 8, 4, 256
    keys2 = jax.random.split(jax.random.PRNGKey(1), N2)
    x_list2 = [jax.random.normal(k, (B2, D2), dtype=jnp.float32) for k in keys2]
    out2 = jax.block_until_ready(mean_aggregator(x_list2, min_pallas_bytes=0))
    ref2 = _reference(x_list2)
    assert out2.shape == (B2, D2)
    assert jnp.allclose(out2, ref2, atol=1e-6, rtol=1e-6)

    # 3) Force the Pallas kernel on the non-lane-dense fallback (B*D % 128 != 0).
    B3, N3, D3 = 4, 3, 50
    keys3 = jax.random.split(jax.random.PRNGKey(2), N3)
    x_list3 = [jax.random.normal(k, (B3, D3), dtype=jnp.float32) for k in keys3]
    out3 = jax.block_until_ready(mean_aggregator(x_list3, min_pallas_bytes=0))
    ref3 = _reference(x_list3)
    assert out3.shape == (B3, D3)
    assert jnp.allclose(out3, ref3, atol=1e-6, rtol=1e-6)

    print("KERNEL_OK")
</pallas_src>

<mosaic_0001>
module attributes {stable_mosaic.version = 11 : i64} {
  func.func @kernel(%arg0: i32, %arg1: memref<2x1024xf32, #tpu.memory_space<vmem>>, %arg2: memref<2x1024xf32, #tpu.memory_space<vmem>>, %arg3: memref<2x1024xf32, #tpu.memory_space<vmem>>, %arg4: memref<2x1024xf32, #tpu.memory_space<vmem>>, %arg5: memref<2x1024xf32, #tpu.memory_space<vmem>>) attributes {dimension_semantics = [#tpu.dimension_semantics<parallel>], iteration_bounds = array<i64: 1>, scalar_prefetch = 0 : i64, scratch_operands = 0 : i64, tpu.core_type = #tpu.core_type<tc>, window_params = [{transform_indices = @transform_0, window_bounds = array<i64: 2, 1024>}, {transform_indices = @transform_1, window_bounds = array<i64: 2, 1024>}, {transform_indices = @transform_2, window_bounds = array<i64: 2, 1024>}, {transform_indices = @transform_3, window_bounds = array<i64: 2, 1024>}, {transform_indices = @transform_4, window_bounds = array<i64: 2, 1024>}]} {
    %c0 = arith.constant 0 : index
    %c0_0 = arith.constant 0 : index
    %0 = vector.load %arg1[%c0, %c0_0] : memref<2x1024xf32, #tpu.memory_space<vmem>>, vector<2x1024xf32>
    %c0_1 = arith.constant 0 : index
    %c0_2 = arith.constant 0 : index
    %1 = vector.load %arg2[%c0_1, %c0_2] : memref<2x1024xf32, #tpu.memory_space<vmem>>, vector<2x1024xf32>
    %2 = arith.addf %0, %1 : vector<2x1024xf32>
    %c0_3 = arith.constant 0 : index
    %c0_4 = arith.constant 0 : index
    %3 = vector.load %arg3[%c0_3, %c0_4] : memref<2x1024xf32, #tpu.memory_space<vmem>>, vector<2x1024xf32>
    %4 = arith.addf %2, %3 : vector<2x1024xf32>
    %c0_5 = arith.constant 0 : index
    %c0_6 = arith.constant 0 : index
    %5 = vector.load %arg4[%c0_5, %c0_6] : memref<2x1024xf32, #tpu.memory_space<vmem>>, vector<2x1024xf32>
    %6 = arith.addf %4, %5 : vector<2x1024xf32>
    %cst = arith.constant 2.500000e-01 : f32
    %7 = vector.broadcast %cst : f32 to vector<2x1024xf32>
    %8 = arith.mulf %6, %7 : vector<2x1024xf32>
    %c0_7 = arith.constant 0 : index
    %c0_8 = arith.constant 0 : index
    %9 = vector.load %arg5[%c0_7, %c0_8] : memref<2x1024xf32, #tpu.memory_space<vmem>>, vector<2x1024xf32>
    tpu.vector_store %arg5[%c0_7, %c0_8], %8 {strides = array<i32>} : memref<2x1024xf32, #tpu.memory_space<vmem>>, vector<2x1024xf32>,
    return
  }
  func.func @transform_0(%arg0: i32) -> (i32, i32) {
    %c0_i32 = arith.constant 0 : i32
    %c0_i32_0 = arith.constant 0 : i32
    return %arg0, %c0_i32 : i32, i32
  }
  func.func @transform_1(%arg0: i32) -> (i32, i32) {
    %c0_i32 = arith.constant 0 : i32
    %c0_i32_0 = arith.constant 0 : i32
    return %arg0, %c0_i32 : i32, i32
  }
  func.func @transform_2(%arg0: i32) -> (i32, i32) {
    %c0_i32 = arith.constant 0 : i32
    %c0_i32_0 = arith.constant 0 : i32
    return %arg0, %c0_i32 : i32, i32
  }
  func.func @transform_3(%arg0: i32) -> (i32, i32) {
    %c0_i32 = arith.constant 0 : i32
    %c0_i32_0 = arith.constant 0 : i32
    return %arg0, %c0_i32 : i32, i32
  }
  func.func @transform_4(%arg0: i32) -> (i32, i32) {
    %c0_i32 = arith.constant 0 : i32
    %c0_i32_0 = arith.constant 0 : i32
    return %arg0, %c0_i32 : i32, i32
  }
}

</mosaic_0001>

<bundles_post_ra>
// kernel: tpu_custom_call.1
= control target key start
LH: loop header
LB: loop body
LE: loop exit
PB: predicated region body
PF: predicated region fallthrough
CT: control target
= control target key end

     0   :  { %9 = vsyncpa [#allocation3], 0  ;;  %s313_s0 = inlined_call_operand.hbm [shape: f32[2,1024], index: 0, kind: input, shape index: {}]   ;;  %s314_s1 = inlined_call_operand.hbm [shape: f32[2,1024], index: 1, kind: input, shape index: {}]   ;;  %s315_s2 = inlined_call_operand.hbm [shape: f32[2,1024], index: 2, kind: input, shape index: {}]   ;;  %s316_s3 = inlined_call_operand.hbm [shape: f32[2,1024], index: 3, kind: input, shape index: {}]   ;;  %s317_s4 = inlined_call_operand.hbm [shape: f32[2,1024], index: 4, kind: output, shape index: {}]  }
   0x1   :  { %10 = vsyncpa [#allocation6], 0 }
   0x2   :  { %11 = vsyncpa [#allocation9], 0 }
   0x3   :  { %12 = vsyncpa [#allocation4], 0  ;;  %s223_s15 = smov [#allocation5]   ;;  %s224_s17 = smov [#allocation2]  }
   0x4   :  { %s29_s16 = sshll.u32 %s223_s15, 4  ;;  %s19_s18 = sshll.u32 %s224_s17, 4  ;;  %s30_s16 = int_to_ptr.vmem [resolvable:$true] %s29_s16  ;;  %s20_s18 = int_to_ptr.vmem [resolvable:$true] %s19_s18 }
   0x5   :  { %s105_s21 = scalar_lea.hbm %s314_s1, 256 }
   0x6   :  { %p106_p0 = scmp.ne.s32.totalorder %s314_s1, %s105_s21  ;;  %p109_p1 = scmp.lt.u32.totalorder %s105_s21, %s314_s1 }
   0x8   :  { %p111_p2 = pnand %p109_p1, %p106_p0 }
   0xa   :  { %114 = shalt.err (!%p111_p2)
}
   0xb   :  { %s115_s26 = scalar_lea.vmem %s30_s16, 256  ;;  %p120_p4 = scmp.lt.s32.totalorder %s30_s16, %s30_s16 }
   0xc   :  { %p116_p3 = scmp.ne.s32.totalorder %s30_s16, %s115_s26  ;;  %p121_p5 = scmp.lt.s32.totalorder %s115_s26, %s115_s26 }
   0xe   :  { %p122_p6 = por %p121_p5, %p120_p4 }
  0x10   :  { %p123_p7 = pnand %p122_p6, %p116_p3 }
  0x12   :  { %126 = shalt.err (!%p123_p7)
}
  0x13   :  { %32 = dma.hbm_to_vmem [thread:$0]  %s314_s1, 256, %s30_s16, [#allocation6]  }
  0x14   :  { %s127_s5 = scalar_lea.hbm %s313_s0, 256 }
  0x15   :  { %p128_p8 = scmp.ne.s32.totalorder %s313_s0, %s127_s5  ;;  %p131_p9 = scmp.lt.u32.totalorder %s127_s5, %s313_s0 }
  0x17   :  { %p133_p10 = pnand %p131_p9, %p128_p8 }
  0x19   :  { %136 = shalt.err (!%p133_p10)
}
  0x1a   :  { %s137_s10 = scalar_lea.vmem %s20_s18, 256  ;;  %p142_p12 = scmp.lt.s32.totalorder %s20_s18, %s20_s18 }
  0x1b   :  { %p138_p11 = scmp.ne.s32.totalorder %s20_s18, %s137_s10  ;;  %p143_p13 = scmp.lt.s32.totalorder %s137_s10, %s137_s10 }
  0x1d   :  { %p144_p0 = por %p143_p13, %p142_p12 }
  0x1f   :  { %p145_p1 = pnand %p144_p0, %p138_p11 }
  0x21   :  { %148 = shalt.err (!%p145_p1)
}
  0x22   :  { %22 = dma.hbm_to_vmem [thread:$0]  %s313_s0, 256, %s20_s18, [#allocation3]  }
  0x23   :  { %s225_s12 = smov [#allocation7]   ;;  %s226_s14 = smov [#allocation8]  }
  0x24   :  { %s39_s13 = sshll.u32 %s225_s12, 4  ;;  %s49_s15 = sshll.u32 %s226_s14, 4  ;;  %s40_s13 = int_to_ptr.vmem [resolvable:$true] %s39_s13  ;;  %s50_s15 = int_to_ptr.vmem [resolvable:$true] %s49_s15 }
  0x25   :  { %s149_s19 = scalar_lea.hbm %s315_s2, 256 }
  0x26   :  { %p150_p2 = scmp.ne.s32.totalorder %s315_s2, %s149_s19  ;;  %p153_p3 = scmp.lt.u32.totalorder %s149_s19, %s315_s2 }
  0x28   :  { %p155_p4 = pnand %p153_p3, %p150_p2 }
  0x2a   :  { %158 = shalt.err (!%p155_p4)
}
  0x2b   :  { %s159_s0 = scalar_lea.vmem %s40_s13, 256  ;;  %p164_p6 = scmp.lt.s32.totalorder %s40_s13, %s40_s13 }
  0x2c   :  { %p160_p5 = scmp.ne.s32.totalorder %s40_s13, %s159_s0  ;;  %p165_p7 = scmp.lt.s32.totalorder %s159_s0, %s159_s0 }
  0x2e   :  { %p166_p8 = por %p165_p7, %p164_p6 }
  0x30   :  { %p167_p9 = pnand %p166_p8, %p160_p5 }
  0x32   :  { %170 = shalt.err (!%p167_p9)
}
  0x33   :  { %42 = dma.hbm_to_vmem [thread:$0]  %s315_s2, 256, %s40_s13, [#allocation6]  }
  0x34   :  { %s171_s27 = scalar_lea.hbm %s316_s3, 256 }
  0x35   :  { %p172_p10 = scmp.ne.s32.totalorder %s316_s3, %s171_s27  ;;  %p175_p11 = scmp.lt.u32.totalorder %s171_s27, %s316_s3 }
  0x37   :  { %p177_p12 = pnand %p175_p11, %p172_p10 }
  0x39   :  { %180 = shalt.err (!%p177_p12)
}
  0x3a   :  { %s181_s6 = scalar_lea.vmem %s50_s15, 256  ;;  %p186_p0 = scmp.lt.s32.totalorder %s50_s15, %s50_s15 }
  0x3b   :  { %p182_p13 = scmp.ne.s32.totalorder %s50_s15, %s181_s6  ;;  %p187_p1 = scmp.lt.s32.totalorder %s181_s6, %s181_s6 }
  0x3d   :  { %p188_p2 = por %p187_p1, %p186_p0 }
  0x3f   :  { %p189_p3 = pnand %p188_p2, %p182_p13 }
  0x41   :  { %192 = shalt.err (!%p189_p3)
}
  0x42   :  { %52 = dma.hbm_to_vmem [thread:$0]  %s316_s3, 256, %s50_s15, [#allocation9]  }
  0x43   :  { %215 = dma.done.wait [#allocation3], 256  }
  0x44   :  { %216 = vsyncadd [#allocation3], 4294967040 }
  0x45   :  { %217 = dma.done.wait [#allocation6], 512  }
  0x46   :  { %218 = vsyncadd [#allocation6], 4294966784 }
  0x47   :  { %219 = dma.done.wait [#allocation9], 256  }
  0x48   :  { %220 = vsyncadd [#allocation9], 4294967040  ;;  %v65_v0 = vld [vmem:[#allocation2] sm:$0xff]  ;;  %v67_v1 = vld [vmem:[#allocation5] sm:$0xff]  ;;  %s227_s3 = smov [#allocation10]  }
  0x49   :  { %v71_v2 = vld [vmem:[#allocation7] sm:$0xff]  ;;  %v69_v3 = vadd.f32 %v67_v1, %v65_v0  ;;  %v66_v4 = vld [vmem:[#allocation2 + $0x8] sm:$0xff]  ;;  %v68_v5 = vld [vmem:[#allocation5 + $0x8] sm:$0xff]  ;;  %s89_s8 = sshll.u32 %s227_s3, 4  ;;  %s90_s8 = int_to_ptr.vmem [resolvable:$true] %s89_s8 }
  0x4a   :  { %v75_v6 = vld [vmem:[#allocation8] sm:$0xff]  ;;  %v70_v7 = vadd.f32 %v68_v5, %v66_v4  ;;  %v72_v8 = vld [vmem:[#allocation7 + $0x8] sm:$0xff]  ;;  %v76_v10 = vld [vmem:[#allocation8 + $0x8] sm:$0xff]  ;;  %s193_s9 = scalar_lea.vmem %s90_s8, 256  ;;  %p198_p5 = scmp.lt.s32.totalorder %s90_s8, %s90_s8 }
  0x4b   :  { %v73_v9 = vadd.f32 %v71_v2, %v69_v3  ;;  %p194_p4 = scmp.ne.s32.totalorder %s90_s8, %s193_s9  ;;  %p199_p6 = scmp.lt.s32.totalorder %s193_s9, %s193_s9 }
  0x4c   :  { %v74_v11 = vadd.f32 %v72_v8, %v70_v7 }
  0x4d   :  { %v77_v12 = vadd.f32 %v75_v6, %v73_v9  ;;  %p200_p7 = por %p199_p6, %p198_p5 }
  0x4e   :  { %v78_v13 = vadd.f32 %v76_v10, %v74_v11 }
  0x4f   :  { %v79_v14 = vmul.f32 0.25, %v77_v12  ;;  %p201_p8 = pnand %p200_p7, %p194_p4 }
  0x50   :  { %v80_v15 = vmul.f32 0.25, %v78_v13 }
  0x51   :  { %81 = vst [vmem:[#allocation10] sm:$0xff] %v79_v14 }
  0x52   :  { %82 = vst [vmem:[#allocation10 + $0x8] sm:$0xff] %v80_v15 }
  0x53   :  { %204 = shalt.err (!%p201_p8)
}
  0x54   :  { %s205_s11 = scalar_lea.hbm %s317_s4, 256 }
  0x55   :  { %p206_p9 = scmp.ne.s32.totalorder %s317_s4, %s205_s11  ;;  %p209_p10 = scmp.lt.u32.totalorder %s205_s11, %s317_s4 }
  0x57   :  { %p211_p11 = pnand %p209_p10, %p206_p9 }
  0x59   :  { %214 = shalt.err (!%p211_p11)
}
  0x5a   :  { %92 = dma.vmem_to_hbm [thread:$0]  %s90_s8, 256, %s317_s4, [#allocation4]  }
  0x5b   :  { %221 = dma.done.wait [#allocation4], 256  }
  0x5c   :  { %222 = vsyncadd [#allocation4], 4294967040 }
  0x5d   :  { %96 = vsyncpa [#allocation3], 1 }
  0x5e   :  { %97 = vsyncpa [#allocation6], 1 }
  0x5f   :  { %98 = vsyncpa [#allocation9], 1 }
  0x60   :  { %99 = vsyncpa [#allocation4], 1 }

</bundles_post_ra>
